<compile_context>
chip_gen: v7x
topology: tpu7x:2x2x1
jax: 0.10.0
libtpu: 0.0.40
codegen_flags: <defaults>
</compile_context>

<pallas_src>
import functools

import jax
import jax.numpy as jnp
from jax.experimental import pallas as pl
from jax.experimental.pallas import tpu as pltpu

_LANE = 128     # TPU lane width (output store alignment)
_SUBLANE = 8    # sublane width (batch-tile alignment)


def _round_up(n, m):
    return ((n + m - 1) // m) * m


def _pad_axis(arr, axis, target):
    size = arr.shape[axis]
    if target == size:
        return arr
    pad = [(0, 0)] * arr.ndim
    pad[axis] = (0, target - size)
    return jnp.pad(arr, pad)


def _gcod_gnn_kernel(x_ref, w1_ref, b1_ref, w2_ref, b2_ref, o_ref):
    # f32 -> bf16 cast of the activations fused into the kernel (VPU work,
    # hidden under the input DMA / MXU), f32 accumulation on the MXU.
    x = x_ref[...].astype(jnp.bfloat16)
    h = jnp.dot(x, w1_ref[...], preferred_element_type=jnp.float32)
    h = jnp.maximum(h + b1_ref[...], 0.0)                      # bias + ReLU in f32
    logits = jnp.dot(h.astype(jnp.bfloat16), w2_ref[...],
                     preferred_element_type=jnp.float32)
    # Single lane-dense (128-wide) store; downcast to bf16 on store to halve
    # the output HBM writeback.
    o_ref[...] = (logits + b2_ref[...]).astype(o_ref.dtype)


def prepare_params(params):
    """One-time parameter prep (call once, reuse for every forward).

    Pads only the class dim to the 128-lane store width and casts the MXU
    operands to bf16.  `uB` is passed through untouched (unused in forward,
    matching the PyTorch module).
    """
    w1, b1, w2, b2 = params["w1"], params["b1"], params["w2"], params["b2"]
    in_features, hidden = w1.shape
    n_classes = w2.shape[1]
    pn = _round_up(n_classes, _LANE)

    prepared = {
        "w1": w1.astype(jnp.bfloat16),                                   # (K, H)
        "b1": b1.reshape(1, hidden).astype(jnp.float32),                 # (1, H)
        "w2": _pad_axis(w2, 1, pn).astype(jnp.bfloat16),                 # (H, PN)
        "b2": _pad_axis(b2.reshape(1, n_classes), 1, pn).astype(jnp.float32),
        "uB": params["uB"],
    }
    dims = {"in_features": in_features, "hidden": hidden,
            "n_classes": n_classes, "padded_classes": pn}
    return prepared, dims


def _choose_tm(batch, tm_max=1024):
    # Big tiles amortize the ~0.35us fixed cost per grid step, but keep at
    # least 2 grid steps when the batch allows it so v7x's two TensorCores
    # both get work (irrelevant on single-TC v5e/v6e).
    if batch > tm_max:
        tm = tm_max
    elif batch >= 2 * _SUBLANE:
        tm = _round_up(batch, 2 * _SUBLANE) // 2
    else:
        tm = batch
    return max(_SUBLANE, _round_up(tm, _SUBLANE))


def gcod_wrapper_forward(x, prepared, dims, *, tm_max=1024):
    """Equivalent of GCODWrapper.forward: returns logits = gnn(x)."""
    batch, in_features = x.shape
    assert in_features == dims["in_features"]
    hidden = dims["hidden"]
    pn = dims["padded_classes"]

    tm = _choose_tm(batch, tm_max)
    pb = _round_up(batch, tm)
    # Only the batch dim of x is padded; the feature dim stays at its natural
    # size (block covers the full array dim, so no 128-lane padding needed).
    xp = _pad_axis(x, 0, pb)

    flops = 2 * pb * in_features * hidden + 2 * pb * hidden * pn
    bytes_accessed = (xp.size * 4 + prepared["w1"].size * 2
                      + prepared["w2"].size * 2 + prepared["b1"].size * 4
                      + prepared["b2"].size * 4 + pb * pn * 2)

    out_padded = pl.pallas_call(
        _gcod_gnn_kernel,
        out_shape=jax.ShapeDtypeStruct((pb, pn), jnp.bfloat16),
        grid_spec=pl.GridSpec(
            grid=(pb // tm,),
            in_specs=[
                # x: tiled over batch only; auto-pipelined DMA per grid step.
                pl.BlockSpec((tm, in_features), lambda i: (i, 0)),
                # Weights / biases: constant index_map -> stay VMEM-resident.
                pl.BlockSpec((in_features, hidden), lambda i: (0, 0)),
                pl.BlockSpec((1, hidden), lambda i: (0, 0)),
                pl.BlockSpec((hidden, pn), lambda i: (0, 0)),
                pl.BlockSpec((1, pn), lambda i: (0, 0)),
            ],
            out_specs=pl.BlockSpec((tm, pn), lambda i: (i, 0)),
        ),
        compiler_params=pltpu.CompilerParams(
            # Batch tiles are independent -> shard across v7x's 2 TensorCores.
            dimension_semantics=("parallel",),
            # Actual working set (double-buffered x/out tiles + tiny resident
            # bf16 weights) is well under this on every generation.
            vmem_limit_bytes=4 * 1024 * 1024,
        ),
        cost_estimate=pl.CostEstimate(flops=flops, transcendentals=0,
                                      bytes_accessed=bytes_accessed),
    )(xp, prepared["w1"], prepared["b1"], prepared["w2"], prepared["b2"])

    # Slice off the batch/class padding.  Under jit this fuses into the
    # downstream consumer rather than forcing another HBM pass.
    return out_padded[:batch, :dims["n_classes"]]


def init_params(key, in_features, hidden, n_classes, dataset_size):
    k1, k2, k3, k4 = jax.random.split(key, 4)
    return {
        "w1": jax.random.normal(k1, (in_features, hidden), jnp.float32) * 0.1,
        "b1": jax.random.normal(k2, (1, hidden), jnp.float32) * 0.01,
        "w2": jax.random.normal(k3, (hidden, n_classes), jnp.float32) * 0.1,
        "b2": jax.random.normal(k4, (1, n_classes), jnp.float32) * 0.01,
        # GCOD's per-sample uncertainty parameter; present in the module's
        # __init__ but unused in forward (matches PyTorch semantics).
        # TODO(synk): fuse the GCOD loss terms that consume uB into this
        # kernel once the training objective is ported.
        "uB": jnp.zeros((dataset_size,), jnp.float32),
    }


if __name__ == "__main__":
    batch, in_features, hidden, n_classes = 256, 32, 32, 8
    dataset_size = 512

    key = jax.random.PRNGKey(0)
    kx, kp = jax.random.split(key)
    x = jax.random.normal(kx, (batch, in_features), jnp.float32)
    params = init_params(kp, in_features, hidden, n_classes, dataset_size)

    # One-time parameter prep (padding + bf16 cast hoisted out of forward).
    prepared, dims = prepare_params(params)
    prepared = jax.tree_util.tree_map(jax.block_until_ready, prepared)

    fwd = jax.jit(functools.partial(gcod_wrapper_forward,
                                    prepared=prepared, dims=dims))
    logits = fwd(x)
    jax.block_until_ready(logits)
    assert logits.shape == (batch, n_classes)
    assert logits.dtype == jnp.bfloat16

    logits_f32 = logits.astype(jnp.float32)

    # Reference with the same bf16-input / f32-accumulate precision policy.
    xb = x.astype(jnp.bfloat16)
    w1b = params["w1"].astype(jnp.bfloat16)
    w2b = params["w2"].astype(jnp.bfloat16)
    ref_h = jnp.maximum(
        jnp.dot(xb, w1b, preferred_element_type=jnp.float32) + params["b1"], 0.0)
    ref = jnp.dot(ref_h.astype(jnp.bfloat16), w2b,
                  preferred_element_type=jnp.float32) + params["b2"]
    assert jnp.allclose(logits_f32, ref, atol=2e-2, rtol=2e-2), (
        float(jnp.max(jnp.abs(logits_f32 - ref))))

    # Loose sanity check against the full-f32 math as well.
    ref_f32 = (jnp.maximum(x @ params["w1"] + params["b1"], 0.0)
               @ params["w2"] + params["b2"])
    assert jnp.allclose(logits_f32, ref_f32, atol=5e-2, rtol=5e-2), (
        float(jnp.max(jnp.abs(logits_f32 - ref_f32))))

    print("KERNEL_OK")
</pallas_src>

<mosaic_0001>
module attributes {stable_mosaic.version = 11 : i64} {
  func.func @_gcod_gnn_kernel(%arg0: i32, %arg1: memref<128x32xf32, #tpu.memory_space<vmem>>, %arg2: memref<32x32xbf16, #tpu.memory_space<vmem>>, %arg3: memref<1x32xf32, #tpu.memory_space<vmem>>, %arg4: memref<32x128xbf16, #tpu.memory_space<vmem>>, %arg5: memref<1x128xf32, #tpu.memory_space<vmem>>, %arg6: memref<128x128xbf16, #tpu.memory_space<vmem>>) attributes {dimension_semantics = [#tpu.dimension_semantics<parallel>], iteration_bounds = array<i64: 2>, scalar_prefetch = 0 : i64, scratch_operands = 0 : i64, tpu.core_type = #tpu.core_type<tc>, window_params = [{transform_indices = @transform_0, window_bounds = array<i64: 128, 32>}, {pipeline_mode = #tpu.pipeline_mode<synchronous>, transform_indices = @transform_1, window_bounds = array<i64: 32, 32>}, {pipeline_mode = #tpu.pipeline_mode<synchronous>, transform_indices = @transform_2, window_bounds = array<i64: 1, 32>}, {pipeline_mode = #tpu.pipeline_mode<synchronous>, transform_indices = @transform_3, window_bounds = array<i64: 32, 128>}, {pipeline_mode = #tpu.pipeline_mode<synchronous>, transform_indices = @transform_4, window_bounds = array<i64: 1, 128>}, {transform_indices = @transform_5, window_bounds = array<i64: 128, 128>}]} {
    %c0 = arith.constant 0 : index
    %c0_0 = arith.constant 0 : index
    %0 = vector.load %arg1[%c0, %c0_0] : memref<128x32xf32, #tpu.memory_space<vmem>>, vector<128x32xf32>
    %1 = arith.truncf %0 : vector<128x32xf32> to vector<128x32xbf16>
    %c0_1 = arith.constant 0 : index
    %c0_2 = arith.constant 0 : index
    %2 = vector.load %arg2[%c0_1, %c0_2] : memref<32x32xbf16, #tpu.memory_space<vmem>>, vector<32x32xbf16>
    %cst = arith.constant dense<0.000000e+00> : vector<128x32xf32>
    %3 = tpu.matmul %1, %2, %cst {dimension_numbers = #tpu.dot_dimension_numbers<[1], [0], [0], [1], [0, 0, 1, 1], [], []>} : vector<128x32xbf16>, vector<32x32xbf16>, vector<128x32xf32> -> vector<128x32xf32>
    %c0_3 = arith.constant 0 : index
    %c0_4 = arith.constant 0 : index
    %4 = vector.load %arg3[%c0_3, %c0_4] : memref<1x32xf32, #tpu.memory_space<vmem>>, vector<1x32xf32>
    %5 = vector.broadcast %4 : vector<1x32xf32> to vector<128x32xf32>
    %6 = arith.addf %3, %5 : vector<128x32xf32>
    %cst_5 = arith.constant 0.000000e+00 : f32
    %7 = vector.broadcast %cst_5 : f32 to vector<128x32xf32>
    %8 = arith.maximumf %6, %7 : vector<128x32xf32>
    %9 = arith.truncf %8 : vector<128x32xf32> to vector<128x32xbf16>
    %c0_6 = arith.constant 0 : index
    %c0_7 = arith.constant 0 : index
    %10 = vector.load %arg4[%c0_6, %c0_7] : memref<32x128xbf16, #tpu.memory_space<vmem>>, vector<32x128xbf16>
    %cst_8 = arith.constant dense<0.000000e+00> : vector<128x128xf32>
    %11 = tpu.matmul %9, %10, %cst_8 {dimension_numbers = #tpu.dot_dimension_numbers<[1], [0], [0], [1], [0, 0, 1, 1], [], []>} : vector<128x32xbf16>, vector<32x128xbf16>, vector<128x128xf32> -> vector<128x128xf32>
    %c0_9 = arith.constant 0 : index
    %c0_10 = arith.constant 0 : index
    %12 = vector.load %arg5[%c0_9, %c0_10] : memref<1x128xf32, #tpu.memory_space<vmem>>, vector<1x128xf32>
    %13 = vector.broadcast %12 : vector<1x128xf32> to vector<128x128xf32>
    %14 = arith.addf %11, %13 : vector<128x128xf32>
    %15 = arith.truncf %14 : vector<128x128xf32> to vector<128x128xbf16>
    %c0_11 = arith.constant 0 : index
    %c0_12 = arith.constant 0 : index
    %16 = vector.load %arg6[%c0_11, %c0_12] : memref<128x128xbf16, #tpu.memory_space<vmem>>, vector<128x128xbf16>
    tpu.vector_store %arg6[%c0_11, %c0_12], %15 {strides = array<i32>} : memref<128x128xbf16, #tpu.memory_space<vmem>>, vector<128x128xbf16>,
    return
  }
  func.func @transform_0(%arg0: i32) -> (i32, i32) {
    %c0_i32 = arith.constant 0 : i32
    %c0_i32_0 = arith.constant 0 : i32
    return %arg0, %c0_i32 : i32, i32
  }
  func.func @transform_1(%arg0: i32) -> (i32, i32) {
    %c0_i32 = arith.constant 0 : i32
    %c0_i32_0 = arith.constant 0 : i32
    %c0_i32_1 = arith.constant 0 : i32
    return %c0_i32, %c0_i32_0 : i32, i32
  }
  func.func @transform_2(%arg0: i32) -> (i32, i32) {
    %c0_i32 = arith.constant 0 : i32
    %c0_i32_0 = arith.constant 0 : i32
    %c0_i32_1 = arith.constant 0 : i32
    return %c0_i32, %c0_i32_0 : i32, i32
  }
  func.func @transform_3(%arg0: i32) -> (i32, i32) {
    %c0_i32 = arith.constant 0 : i32
    %c0_i32_0 = arith.constant 0 : i32
    %c0_i32_1 = arith.constant 0 : i32
    return %c0_i32, %c0_i32_0 : i32, i32
  }
  func.func @transform_4(%arg0: i32) -> (i32, i32) {
    %c0_i32 = arith.constant 0 : i32
    %c0_i32_0 = arith.constant 0 : i32
    %c0_i32_1 = arith.constant 0 : i32
    return %c0_i32, %c0_i32_0 : i32, i32
  }
  func.func @transform_5(%arg0: i32) -> (i32, i32) {
    %c0_i32 = arith.constant 0 : i32
    %c0_i32_0 = arith.constant 0 : i32
    return %arg0, %c0_i32 : i32, i32
  }
}

</mosaic_0001>

<bundles_post_ra>
// kernel: gcod_wrapper_forward.1
= control target key start
LH: loop header
LB: loop body
LE: loop exit
PB: predicated region body
PF: predicated region fallthrough
CT: control target
= control target key end

     0   :  { %s924_s18 = smov 0   ;;  %s1007_s0 = inlined_call_operand.vmem [shape: f32[256,32], index: 0, kind: input, shape index: {}]   ;;  %s1008_s1 = inlined_call_operand.vmem [shape: bf16[32,32], index: 1, kind: input, shape index: {}]   ;;  %s1009_s2 = inlined_call_operand.vmem [shape: f32[1,32], index: 2, kind: input, shape index: {}]   ;;  %s1010_s3 = inlined_call_operand.vmem [shape: bf16[32,128], index: 3, kind: input, shape index: {}]   ;;  %s1011_s4 = inlined_call_operand.vmem [shape: f32[1,128], index: 4, kind: input, shape index: {}]   ;;  %s1012_s5 = inlined_call_operand.vmem [shape: bf16[256,128], index: 5, kind: output, shape index: {}]  }
   0x1 LB: > { %s702_s19 = sadd.s32 4294967295, %s892_s18   ;;  %p706_p0 = scmp.ge.s32.totalorder %s892_s18, 1  ;;  %s892_s18 = sphi %s924_s18, %s15_s18  }
   0x2   : > { %p188_p1 = scmp.lt.s32.totalorder %s892_s18, 3 }
   0x4   : > { %p189_p2 = pnand %p706_p0, %p188_p1 }
   0x5   : > { %v882_v0 = vld [vmem:[%s1008_s1] sm:$0xff] (!%p189_p2)   ;;  %s707_s22 = sshll.u32 (!%p189_p2), %s702_s19, 4  ;;  %v883_v1 = vld [vmem:[%s1008_s1 + $0x8] sm:$0xff] (!%p189_p2)   ;;  %vm276_vm0 = vcmask (!%p189_p2), 261120  }
   0x6   : > { %192 = sbr.rel (%p189_p2) target bundleno = 486 (0x1e6), region = 40  ;;  %p217_p3 = scmp.lt.s32.totalorder (!%p189_p2), %s707_s22, 31  ;;  %834 = vmatprep.subr.bf16.mxu0 (!%p189_p2), %v882_v0  ;;  %v884_v26 = vld [vmem:[%s1010_s3] sm:$0xff] (!%p189_p2)   ;;  %v885_v27 = vld [vmem:[%s1010_s3 + $0x8] sm:$0xff] (!%p189_p2)  }
   0x7   : > { %835 = vmatpush3.bf16.msra.mxu0 (!%p189_p2), %v882_v0  ;;  %854 = vmatprep.subr.bf16.mxu1 (!%p189_p2), %v884_v26  ;;  %v711_v28 = vld [vmem:[%s1009_s2] ss:$0 sm:$0xff] (!%p189_p2) }
   0x8   : > { %836 = vmatprep.subr.bf16.mxu0 (!%p189_p2), %v883_v1  ;;  %855 = vmatpush3.bf16.msra.mxu1 (!%p189_p2), %v884_v26 }
   0x9   : > { %856 = vmatprep.subr.bf16.mxu1 (!%p189_p2), %v885_v27 }
   0xb   : > { %837 = vmatpush3.bf16.msra.mxu0 (!%p189_p2), %v883_v1 }
   0xc   : > { %857 = vmatpush3.bf16.msra.mxu1 (!%p189_p2), %v885_v27 }
   0xd   : > { %s1014_s22 = smov (!%p217_p3, %s707_s22), 31 }
   0xe   : > { %s708_s25 = sshll.u32 %s1014_s22, 3  ;;  %s710_s12 = sshll.u32 %s1014_s22, 2 }
   0xf   : > { %s944_s28 = scalar_lea.vmem %s1007_s0, %s708_s25  ;;  %s994_s15 = scalar_lea.vmem %s1012_s5, %s710_s12 }
  0x10   : > { %v229_v2 = vld [vmem:[%s944_s28] sm:$0xff]  ;;  %v230_v3 = vld [vmem:[%s944_s28 + $0x8] sm:$0xff]  ;;  %v231_v4 = vld [vmem:[%s944_s28 + $0x10] sm:$0xff] }
  0x11   : > { %v245_v5 = vpack.c.bf16 %v230_v3, %v229_v2  ;;  %v232_v6 = vld [vmem:[%s944_s28 + $0x18] sm:$0xff]  ;;  %v233_v7 = vld [vmem:[%s944_s28 + $0x20] sm:$0xff]  ;;  %v234_v8 = vld [vmem:[%s944_s28 + $0x28] sm:$0xff] }
  0x12   : > { %v246_v9 = vpack.c.bf16 %v232_v6, %v231_v4  ;;  %v247_v10 = vpack.c.bf16 %v234_v8, %v233_v7  ;;  %v235_v11 = vld [vmem:[%s944_s28 + $0x30] sm:$0xff]  ;;  %v236_v12 = vld [vmem:[%s944_s28 + $0x38] sm:$0xff]  ;;  %v237_v13 = vld [vmem:[%s944_s28 + $0x40] sm:$0xff] }
  0x13   : > { %838 = vmatprep.mubr.msk.bf16.mxu0 %vm276_vm0, %v245_v5  ;;  %v238_v14 = vld [vmem:[%s944_s28 + $0x48] sm:$0xff]  ;;  %v248_v15 = vpack.c.bf16 %v236_v12, %v235_v11  ;;  %v239_v17 = vld [vmem:[%s944_s28 + $0x50] sm:$0xff]  ;;  %v240_v18 = vld [vmem:[%s944_s28 + $0x58] sm:$0xff] }
  0x14   : > { %839 = vmatmul.mubr.msk.bf16.vlgmr.msra.gmra.mrb[0].mxu0 %vm276_vm0, %v246_v9  ;;  %v249_v16 = vpack.c.bf16 %v238_v14, %v237_v13  ;;  %v241_v19 = vld [vmem:[%s944_s28 + $0x60] sm:$0xff]  ;;  %v242_v20 = vld [vmem:[%s944_s28 + $0x68] sm:$0xff]  ;;  %v250_v21 = vpack.c.bf16 %v240_v18, %v239_v17  ;;  %v243_v23 = vld [vmem:[%s944_s28 + $0x70] sm:$0xff] }
  0x15   : > { %842 = vmatprep.mubr.msk.bf16.mxu0 %vm276_vm0, %v247_v10  ;;  %v251_v22 = vpack.c.bf16 %v242_v20, %v241_v19  ;;  %v244_v24 = vld [vmem:[%s944_s28 + $0x78] sm:$0xff] }
  0x16   : > { %v252_v25 = vpack.c.bf16 %v244_v24, %v243_v23 }
  0x1c   : > { %843 = vmatmul.mubr.msk.bf16.gmra.mrb[4].mxu0 %vm276_vm0, %v248_v15 }
  0x1d   : > { %846 = vmatprep.mubr.msk.bf16.mxu0 %vm276_vm0, %v249_v16 }
  0x24   : > { %847 = vmatmul.mubr.msk.bf16.gmra.mrb[8].mxu0 %vm276_vm0, %v250_v21 }
  0x25   : > { %850 = vmatprep.mubr.msk.bf16.mxu0 %vm276_vm0, %v251_v22  ;;  %v722_v22 = vld [vmem:[%s1011_s4] ss:$0 sm:$0xff] }
  0x2c   : > { %851 = vmatmul.mubr.msk.bf16.gmra.mrb[12].mxu0 %vm276_vm0, %v252_v25 }
  0xe7   : > { %v840_v29 = vpop.f32.mrb[0].mxu0 }
  0xe8   : > { %v344_v30 = vadd.f32 %v840_v29, %v711_v28  ;;  %v335_v31 = vpop.f32.mrb[1].mxu0 }
  0xe9   : > { %v336_v32 = vadd.f32 %v711_v28, %v335_v31  ;;  %v841_v33 = vpop.f32.mrb[2].mxu0 }
  0xea   : > { %v347_v34 = vadd.f32 %v841_v33, %v711_v28  ;;  %v338_v35 = vpop.f32.mrb[3].mxu0  ;;  %v400_v37 = vmax.f32 %v344_v30, 0.0 }
  0xeb   : > { %v339_v36 = vadd.f32 %v711_v28, %v338_v35  ;;  %v398_v39 = vmax.f32 %v336_v32, 0.0 }
  0xec   : > { %v401_v38 = vmax.f32 %v347_v34, 0.0 }
  0xed   : > { %v399_v40 = vmax.f32 %v339_v36, 0.0 }
  0xee   : > { %v415_v41 = vpack.c.bf16 %v401_v38, %v400_v37 }
  0xef   : > { %v844_v42 = vpop.f32.mrb[4].mxu0  ;;  %v414_v43 = vpack.c.bf16 %v399_v40, %v398_v39 }
  0xf0   : > { %v360_v44 = vadd.f32 %v844_v42, %v711_v28  ;;  %v351_v45 = vpop.f32.mrb[5].mxu0 }
  0xf1   : > { %v352_v46 = vadd.f32 %v711_v28, %v351_v45  ;;  %v845_v47 = vpop.f32.mrb[6].mxu0  ;;  %858 = vmatprep.mubr.msk.bf16.mxu1 %vm276_vm0, %v414_v43 }
  0xf2   : > { %v363_v48 = vadd.f32 %v845_v47, %v711_v28  ;;  %v354_v49 = vpop.f32.mrb[7].mxu0  ;;  %859 = vmatmul.mubr.msk.bf16.vlgmr.msra.gmra.mrb[0].mxu1 %vm276_vm0, %v415_v41  ;;  %v404_v51 = vmax.f32 %v360_v44, 0.0 }
  0xf3   : > { %v355_v50 = vadd.f32 %v711_v28, %v354_v49  ;;  %v402_v53 = vmax.f32 %v352_v46, 0.0 }
  0xf4   : > { %v405_v52 = vmax.f32 %v363_v48, 0.0 }
  0xf5   : > { %v403_v54 = vmax.f32 %v355_v50, 0.0 }
  0xf6   : > { %v417_v55 = vpack.c.bf16 %v405_v52, %v404_v51 }
  0xf7   : > { %v416_v56 = vpack.c.bf16 %v403_v54, %v402_v53  ;;  %v848_v57 = vpop.f32.mrb[8].mxu0 }
  0xf8   : > { %v376_v58 = vadd.f32 %v848_v57, %v711_v28  ;;  %v367_v59 = vpop.f32.mrb[9].mxu0 }
  0xf9   : > { %v368_v60 = vadd.f32 %v711_v28, %v367_v59  ;;  %v849_v61 = vpop.f32.mrb[10].mxu0  ;;  %862 = vmatprep.mubr.msk.bf16.mxu1 %vm276_vm0, %v416_v56 }
  0xfa   : > { %v379_v62 = vadd.f32 %v849_v61, %v711_v28  ;;  %v370_v63 = vpop.f32.mrb[11].mxu0  ;;  %863 = vmatmul.mubr.msk.bf16.gmra.mrb[4].mxu1 %vm276_vm0, %v417_v55  ;;  %v408_v1 = vmax.f32 %v376_v58, 0.0 }
  0xfb   : > { %v371_v0 = vadd.f32 %v711_v28, %v370_v63  ;;  %v406_v3 = vmax.f32 %v368_v60, 0.0 }
  0xfc   : > { %v409_v2 = vmax.f32 %v379_v62, 0.0 }
  0xfd   : > { %v407_v4 = vmax.f32 %v371_v0, 0.0 }
  0xfe   : > { %v419_v5 = vpack.c.bf16 %v409_v2, %v408_v1 }
  0xff   : > { %v418_v6 = vpack.c.bf16 %v407_v4, %v406_v3  ;;  %v852_v7 = vpop.f32.mrb[12].mxu0 }
 0x100   : > { %v392_v8 = vadd.f32 %v852_v7, %v711_v28  ;;  %v383_v9 = vpop.f32.mrb[13].mxu0 }
 0x101   : > { %v384_v10 = vadd.f32 %v711_v28, %v383_v9  ;;  %v853_v11 = vpop.f32.mrb[14].mxu0  ;;  %866 = vmatprep.mubr.msk.bf16.mxu1 %vm276_vm0, %v418_v6 }
 0x102   : > { %v395_v12 = vadd.f32 %v853_v11, %v711_v28  ;;  %v386_v13 = vpop.f32.mrb[15].mxu0  ;;  %867 = vmatmul.mubr.msk.bf16.gmra.mrb[8].mxu1 %vm276_vm0, %v419_v5  ;;  %v412_v15 = vmax.f32 %v392_v8, 0.0 }
 0x103   : > { %v387_v14 = vadd.f32 %v711_v28, %v386_v13  ;;  %v410_v17 = vmax.f32 %v384_v10, 0.0 }
 0x104   : > { %v413_v16 = vmax.f32 %v395_v12, 0.0 }
 0x105   : > { %v411_v18 = vmax.f32 %v387_v14, 0.0 }
 0x106   : > { %v421_v19 = vpack.c.bf16 %v413_v16, %v412_v15 }
 0x107   : > { %v420_v20 = vpack.c.bf16 %v411_v18, %v410_v17 }
 0x109   : > { %870 = vmatprep.mubr.msk.bf16.mxu1 %vm276_vm0, %v420_v20 }
 0x10a   : > { %871 = vmatmul.mubr.msk.bf16.gmra.mrb[12].mxu1 %vm276_vm0, %v421_v19 }
 0x1c5   : > { %v860_v21 = vpop.f32.mrb[0].mxu1 }
 0x1c6   : > { %v503_v23 = vpop.f32.mrb[1].mxu1  ;;  %v512_v25 = vadd.f32 %v860_v21, %v722_v22 }
 0x1c7   : > { %v861_v24 = vpop.f32.mrb[2].mxu1  ;;  %v504_v28 = vadd.f32 %v722_v22, %v503_v23 }
 0x1c8   : > { %v515_v26 = vadd.f32 %v861_v24, %v722_v22  ;;  %v506_v27 = vpop.f32.mrb[3].mxu1 }
 0x1c9   : > { %v507_v29 = vadd.f32 %v722_v22, %v506_v27 }
 0x1ca   : > { %v775_v30 = vpack.c.bf16 %v515_v26, %v512_v25 }
 0x1cb   : > { %v770_v31 = vpack.c.bf16 %v507_v29, %v504_v28 }
 0x1cc   : > { %807 = vst [vmem:[%s994_s15 + $0x8] sm:$0xff] %v775_v30  }
 0x1cd   : > { %771 = vst [vmem:[%s994_s15] sm:$0xff] %v770_v31   ;;  %v864_v32 = vpop.f32.mrb[4].mxu1 }
 0x1ce   : > { %v519_v33 = vpop.f32.mrb[5].mxu1  ;;  %v528_v35 = vadd.f32 %v864_v32, %v722_v22 }
 0x1cf   : > { %v865_v34 = vpop.f32.mrb[6].mxu1  ;;  %v520_v38 = vadd.f32 %v722_v22, %v519_v33 }
 0x1d0   : > { %v531_v36 = vadd.f32 %v865_v34, %v722_v22  ;;  %v522_v37 = vpop.f32.mrb[7].mxu1 }
 0x1d1   : > { %v523_v39 = vadd.f32 %v722_v22, %v522_v37 }
 0x1d2   : > { %v785_v40 = vpack.c.bf16 %v531_v36, %v528_v35 }
 0x1d3   : > { %v780_v41 = vpack.c.bf16 %v523_v39, %v520_v38 }
 0x1d4   : > { %809 = vst [vmem:[%s994_s15 + $0x18] sm:$0xff] %v785_v40  }
 0x1d5   : > { %808 = vst [vmem:[%s994_s15 + $0x10] sm:$0xff] %v780_v41   ;;  %v868_v42 = vpop.f32.mrb[8].mxu1 }
 0x1d6   : > { %v535_v43 = vpop.f32.mrb[9].mxu1  ;;  %v544_v45 = vadd.f32 %v868_v42, %v722_v22 }
 0x1d7   : > { %v869_v44 = vpop.f32.mrb[10].mxu1  ;;  %v536_v48 = vadd.f32 %v722_v22, %v535_v43 }
 0x1d8   : > { %v547_v46 = vadd.f32 %v869_v44, %v722_v22  ;;  %v538_v47 = vpop.f32.mrb[11].mxu1 }
 0x1d9   : > { %v539_v49 = vadd.f32 %v722_v22, %v538_v47 }
 0x1da   : > { %v795_v50 = vpack.c.bf16 %v547_v46, %v544_v45 }
 0x1db   : > { %v790_v51 = vpack.c.bf16 %v539_v49, %v536_v48 }
 0x1dc   : > { %811 = vst [vmem:[%s994_s15 + $0x28] sm:$0xff] %v795_v50  }
 0x1dd   : > { %810 = vst [vmem:[%s994_s15 + $0x20] sm:$0xff] %v790_v51   ;;  %v872_v52 = vpop.f32.mrb[12].mxu1 }
 0x1de   : > { %v551_v53 = vpop.f32.mrb[13].mxu1  ;;  %v560_v55 = vadd.f32 %v872_v52, %v722_v22 }
 0x1df   : > { %v873_v54 = vpop.f32.mrb[14].mxu1  ;;  %v552_v58 = vadd.f32 %v722_v22, %v551_v53 }
 0x1e0   : > { %v563_v56 = vadd.f32 %v873_v54, %v722_v22  ;;  %v554_v57 = vpop.f32.mrb[15].mxu1 }
 0x1e1   : > { %v555_v59 = vadd.f32 %v722_v22, %v554_v57 }
 0x1e2   : > { %v805_v60 = vpack.c.bf16 %v563_v56, %v560_v55 }
 0x1e3   : > { %v800_v61 = vpack.c.bf16 %v555_v59, %v552_v58 }
 0x1e4   : > { %813 = vst [vmem:[%s994_s15 + $0x38] sm:$0xff] %v805_v60  }
 0x1e5   : > { %812 = vst [vmem:[%s994_s15 + $0x30] sm:$0xff] %v800_v61  }
 0x1e6 PF: > { %s15_s18 = sadd.s32 1, %s892_s18  }
 0x1e7   : > { %p12_p4 = scmp.ge.s32.totalorder %s15_s18, 4  }
 0x1e9   :  { %14 = sbr.rel (!%p12_p4) target bundleno = 1 (0x1), region = 70 }

</bundles_post_ra>
